<compile_context>
chip_gen: v7x
topology: tpu7x:2x2x1
jax: 0.10.0
libtpu: 0.0.40
codegen_flags: <defaults>
</compile_context>

<pallas_src>
import functools

import jax
import jax.numpy as jnp
from jax.experimental import pallas as pl
from jax.experimental.pallas import tpu as pltpu

GROUPS = 32  # samples packed per 128-lane row (32 * input_size(4) == 128)


def _round_up(n: int, m: int) -> int:
    return ((n + m - 1) // m) * m


def _block_diag_replicate(w, groups):
    """(k, n) -> (groups*k, groups*n) block-diagonal with `groups` copies of w."""
    k, n = w.shape
    eye = jnp.eye(groups, dtype=w.dtype)
    return jnp.einsum("gh,kn->gkhn", eye, w).reshape(groups * k, groups * n)


def iris_mlp_kernel(x_ref, w1_ref, b1_ref, w2_ref, b2_ref, w3_ref, b3_ref, out_ref,
                    *, precision):
    # Hot path: three lane-dense MXU matmuls + f32 bias/ReLU epilogues, all in VMEM
    # for one packed batch tile.
    x = x_ref[...]                                                     # (TB, 128)

    h1 = jnp.dot(x, w1_ref[...], preferred_element_type=jnp.float32,
                 precision=precision)                                  # (TB, 256) f32
    h1 = jnp.maximum(h1 + b1_ref[...], 0.0)

    h2 = jnp.dot(h1.astype(w2_ref.dtype), w2_ref[...],
                 preferred_element_type=jnp.float32, precision=precision)  # (TB, 512)
    h2 = jnp.maximum(h2 + b2_ref[...], 0.0)

    out = jnp.dot(h2.astype(w3_ref.dtype), w3_ref[...],
                  preferred_element_type=jnp.float32, precision=precision)  # (TB, 96)
    out_ref[...] = (out + b3_ref[...]).astype(out_ref.dtype)


def iris_nn_forward(x, params, *, block_rows=1024, use_bf16=True,
                    matmul_precision=None):
    """Forward pass of IrisNN (inference semantics).

    x: (B, input_size) f32.  params: w1,b1,w2,b2,w3,b3 with weights stored
    transposed relative to PyTorch, i.e. (in_features, out_features); biases
    are (1, out_features).

    use_bf16=True is the perf path (single-pass MXU, halved HBM read traffic);
    accumulation and epilogue remain f32.  For bit-level parity with an f32
    reference, pass use_bf16=False and matmul_precision=jax.lax.Precision.HIGHEST.
    """
    B, in_size = x.shape
    out_size = params["w3"].shape[1]
    G = GROUPS
    assert G * in_size == 128, "packing assumes input_size * GROUPS == 128 lanes"

    # --- choose packed-row tiling ------------------------------------------------
    rows = pl.cdiv(max(B, 1), G)          # packed rows actually needed
    rows_pad = _round_up(rows, 8)         # sublane multiple
    TB = _round_up(min(block_rows, rows_pad), 8)
    # v7x megacore: prefer >=2 "parallel" grid steps when there's enough work.
    if rows_pad > 8 and pl.cdiv(rows_pad, TB) < 2:
        TB = _round_up(pl.cdiv(rows_pad, 2), 8)
    n_tiles = pl.cdiv(rows_pad, TB)
    rows_total = n_tiles * TB
    B_pad = rows_total * G

    compute_dtype = jnp.bfloat16 if use_bf16 else jnp.float32
    itemsize = 2 if use_bf16 else 4

    # --- pack inputs (free metadata reshape after a small pad) -------------------
    x_in = x.astype(compute_dtype)
    if B_pad != B:
        x_in = jnp.pad(x_in, ((0, B_pad - B), (0, 0)))
    x_packed = x_in.reshape(rows_total, G * in_size)                   # (rows, 128)

    # --- 32x block-diagonal replicated weights, lane-tiled biases -----------------
    w1 = _block_diag_replicate(params["w1"].astype(compute_dtype), G)  # (128, 256)
    w2 = _block_diag_replicate(params["w2"].astype(compute_dtype), G)  # (256, 512)
    w3 = _block_diag_replicate(params["w3"].astype(compute_dtype), G)  # (512,  96)
    b1 = jnp.tile(params["b1"].astype(jnp.float32), (1, G))            # (1, 256)
    b2 = jnp.tile(params["b2"].astype(jnp.float32), (1, G))            # (1, 512)
    b3 = jnp.tile(params["b3"].astype(jnp.float32), (1, G))            # (1,  96)

    # Constant index_map -> DMA'd once, VMEM-resident across all grid steps.
    resident = lambda arr: pl.BlockSpec(arr.shape, lambda i: (0, 0))

    flops = 2 * rows_total * (w1.shape[0] * w1.shape[1]
                              + w2.shape[0] * w2.shape[1]
                              + w3.shape[0] * w3.shape[1])
    bytes_accessed = (rows_total * G * in_size * itemsize               # x read
                      + rows_total * G * out_size * 4                   # out write
                      + (w1.size + w2.size + w3.size) * itemsize
                      + (b1.size + b2.size + b3.size) * 4)

    kernel = functools.partial(iris_mlp_kernel, precision=matmul_precision)

    out_packed = pl.pallas_call(
        kernel,
        out_shape=jax.ShapeDtypeStruct((rows_total, G * out_size), jnp.float32),
        grid=(n_tiles,),
        in_specs=[
            pl.BlockSpec((TB, G * in_size), lambda i: (i, 0)),  # x: tiled over batch
            resident(w1), resident(b1),
            resident(w2), resident(b2),
            resident(w3), resident(b3),
        ],
        out_specs=pl.BlockSpec((TB, G * out_size), lambda i: (i, 0)),
        compiler_params=pltpu.CompilerParams(
            dimension_semantics=("parallel",),
        ),
        cost_estimate=pl.CostEstimate(flops=flops, transcendentals=0,
                                      bytes_accessed=bytes_accessed),
    )(x_packed, w1, b1, w2, b2, w3, b3)

    out = out_packed.reshape(B_pad, out_size)                          # free reshape
    return out[:B] if B_pad != B else out


def init_params(key, input_size=4, hidden_sizes=(8, 16), output_size=3):
    """Deterministic init mimicking PyTorch nn.Linear (U(-1/sqrt(fan_in), +1/sqrt(fan_in)))."""
    sizes = [input_size, *hidden_sizes, output_size]
    params = {}
    for i, name in enumerate(["1", "2", "3"]):
        fan_in, fan_out = sizes[i], sizes[i + 1]
        key, kw, kb = jax.random.split(key, 3)
        bound = 1.0 / (fan_in ** 0.5)
        # stored transposed relative to PyTorch: (in_features, out_features)
        params[f"w{name}"] = jax.random.uniform(kw, (fan_in, fan_out), jnp.float32, -bound, bound)
        params[f"b{name}"] = jax.random.uniform(kb, (1, fan_out), jnp.float32, -bound, bound)
    return params


def reference_forward(x, params):
    h1 = jnp.maximum(x @ params["w1"] + params["b1"], 0.0)
    h2 = jnp.maximum(h1 @ params["w2"] + params["b2"], 0.0)
    return h2 @ params["w3"] + params["b3"]


if __name__ == "__main__":
    key = jax.random.PRNGKey(0)
    key, kx, kx2 = jax.random.split(key, 3)

    input_size, hidden_sizes, output_size = 4, (8, 16), 3
    params = init_params(key, input_size, hidden_sizes, output_size)

    # Tolerances: default MXU precision may use reduced-precision passes for f32
    # operands; 2e-2 / 5e-2 comfortably cover that while still catching any
    # packing / block-diagonal / bias layout bug (those give O(1) errors).

    # --- small batch, f32 path (single packed tile, heavy row padding) ---
    batch = 8
    x = jax.random.normal(kx, (batch, input_size), jnp.float32)
    out = jax.block_until_ready(iris_nn_forward(x, params, use_bf16=False))
    ref = reference_forward(x, params)
    assert out.shape == (batch, output_size), out.shape
    assert jnp.allclose(out, ref, atol=2e-2, rtol=2e-2), "mismatch vs reference (small batch)"

    # --- larger, non-multiple batch: multi-step grid + padding + slicing ---
    batch2 = 1000
    x2 = jax.random.normal(kx2, (batch2, input_size), jnp.float32)
    out2 = jax.block_until_ready(
        iris_nn_forward(x2, params, block_rows=8, use_bf16=False))
    ref2 = reference_forward(x2, params)
    assert out2.shape == (batch2, output_size), out2.shape
    assert jnp.allclose(out2, ref2, atol=2e-2, rtol=2e-2), "mismatch vs reference (batched grid)"

    # --- bf16 perf path (single-pass MXU, f32 accumulation/epilogue) ---
    out3 = jax.block_until_ready(iris_nn_forward(x2, params, block_rows=8, use_bf16=True))
    assert out3.shape == (batch2, output_size), out3.shape
    assert jnp.allclose(out3, ref2, atol=5e-2, rtol=5e-2), "mismatch vs reference (bf16)"

    print("KERNEL_OK")
</pallas_src>

<mosaic_0001>
module attributes {stable_mosaic.version = 11 : i64} {
  func.func @iris_mlp_kernel(%arg0: i32, %arg1: memref<8x128xf32, #tpu.memory_space<vmem>>, %arg2: memref<128x256xf32, #tpu.memory_space<vmem>>, %arg3: memref<1x256xf32, #tpu.memory_space<vmem>>, %arg4: memref<256x512xf32, #tpu.memory_space<vmem>>, %arg5: memref<1x512xf32, #tpu.memory_space<vmem>>, %arg6: memref<512x96xf32, #tpu.memory_space<vmem>>, %arg7: memref<1x96xf32, #tpu.memory_space<vmem>>, %arg8: memref<8x96xf32, #tpu.memory_space<vmem>>) attributes {dimension_semantics = [#tpu.dimension_semantics<parallel>], iteration_bounds = array<i64: 1>, scalar_prefetch = 0 : i64, scratch_operands = 0 : i64, tpu.core_type = #tpu.core_type<tc>, window_params = [{transform_indices = @transform_0, window_bounds = array<i64: 8, 128>}, {pipeline_mode = #tpu.pipeline_mode<synchronous>, transform_indices = @transform_1, window_bounds = array<i64: 128, 256>}, {pipeline_mode = #tpu.pipeline_mode<synchronous>, transform_indices = @transform_2, window_bounds = array<i64: 1, 256>}, {pipeline_mode = #tpu.pipeline_mode<synchronous>, transform_indices = @transform_3, window_bounds = array<i64: 256, 512>}, {pipeline_mode = #tpu.pipeline_mode<synchronous>, transform_indices = @transform_4, window_bounds = array<i64: 1, 512>}, {pipeline_mode = #tpu.pipeline_mode<synchronous>, transform_indices = @transform_5, window_bounds = array<i64: 512, 96>}, {pipeline_mode = #tpu.pipeline_mode<synchronous>, transform_indices = @transform_6, window_bounds = array<i64: 1, 96>}, {transform_indices = @transform_7, window_bounds = array<i64: 8, 96>}]} {
    %c0 = arith.constant 0 : index
    %c0_0 = arith.constant 0 : index
    %0 = vector.load %arg1[%c0, %c0_0] : memref<8x128xf32, #tpu.memory_space<vmem>>, vector<8x128xf32>
    %c0_1 = arith.constant 0 : index
    %c0_2 = arith.constant 0 : index
    %1 = vector.load %arg2[%c0_1, %c0_2] : memref<128x256xf32, #tpu.memory_space<vmem>>, vector<128x256xf32>
    %cst = arith.constant dense<0.000000e+00> : vector<8x256xf32>
    %2 = tpu.matmul %0, %1, %cst {dimension_numbers = #tpu.dot_dimension_numbers<[1], [0], [0], [1], [0, 0, 1, 1], [], []>} : vector<8x128xf32>, vector<128x256xf32>, vector<8x256xf32> -> vector<8x256xf32>
    %c0_3 = arith.constant 0 : index
    %c0_4 = arith.constant 0 : index
    %3 = vector.load %arg3[%c0_3, %c0_4] : memref<1x256xf32, #tpu.memory_space<vmem>>, vector<1x256xf32>
    %4 = vector.broadcast %3 : vector<1x256xf32> to vector<8x256xf32>
    %5 = arith.addf %2, %4 : vector<8x256xf32>
    %cst_5 = arith.constant 0.000000e+00 : f32
    %6 = vector.broadcast %cst_5 : f32 to vector<8x256xf32>
    %7 = arith.maximumf %5, %6 : vector<8x256xf32>
    %c0_6 = arith.constant 0 : index
    %c0_7 = arith.constant 0 : index
    %8 = vector.load %arg4[%c0_6, %c0_7] : memref<256x512xf32, #tpu.memory_space<vmem>>, vector<256x512xf32>
    %cst_8 = arith.constant dense<0.000000e+00> : vector<8x512xf32>
    %9 = tpu.matmul %7, %8, %cst_8 {dimension_numbers = #tpu.dot_dimension_numbers<[1], [0], [0], [1], [0, 0, 1, 1], [], []>} : vector<8x256xf32>, vector<256x512xf32>, vector<8x512xf32> -> vector<8x512xf32>
    %c0_9 = arith.constant 0 : index
    %c0_10 = arith.constant 0 : index
    %10 = vector.load %arg5[%c0_9, %c0_10] : memref<1x512xf32, #tpu.memory_space<vmem>>, vector<1x512xf32>
    %11 = vector.broadcast %10 : vector<1x512xf32> to vector<8x512xf32>
    %12 = arith.addf %9, %11 : vector<8x512xf32>
    %cst_11 = arith.constant 0.000000e+00 : f32
    %13 = vector.broadcast %cst_11 : f32 to vector<8x512xf32>
    %14 = arith.maximumf %12, %13 : vector<8x512xf32>
    %c0_12 = arith.constant 0 : index
    %c0_13 = arith.constant 0 : index
    %15 = vector.load %arg6[%c0_12, %c0_13] : memref<512x96xf32, #tpu.memory_space<vmem>>, vector<512x96xf32>
    %cst_14 = arith.constant dense<0.000000e+00> : vector<8x96xf32>
    %16 = tpu.matmul %14, %15, %cst_14 {dimension_numbers = #tpu.dot_dimension_numbers<[1], [0], [0], [1], [0, 0, 1, 1], [], []>} : vector<8x512xf32>, vector<512x96xf32>, vector<8x96xf32> -> vector<8x96xf32>
    %c0_15 = arith.constant 0 : index
    %c0_16 = arith.constant 0 : index
    %17 = vector.load %arg7[%c0_15, %c0_16] : memref<1x96xf32, #tpu.memory_space<vmem>>, vector<1x96xf32>
    %18 = vector.broadcast %17 : vector<1x96xf32> to vector<8x96xf32>
    %19 = arith.addf %16, %18 : vector<8x96xf32>
    %c0_17 = arith.constant 0 : index
    %c0_18 = arith.constant 0 : index
    %20 = vector.load %arg8[%c0_17, %c0_18] : memref<8x96xf32, #tpu.memory_space<vmem>>, vector<8x96xf32>
    tpu.vector_store %arg8[%c0_17, %c0_18], %19 {strides = array<i32>} : memref<8x96xf32, #tpu.memory_space<vmem>>, vector<8x96xf32>,
    return
  }
  func.func @transform_0(%arg0: i32) -> (i32, i32) {
    %c0_i32 = arith.constant 0 : i32
    %c0_i32_0 = arith.constant 0 : i32
    return %arg0, %c0_i32 : i32, i32
  }
  func.func @transform_1(%arg0: i32) -> (i32, i32) {
    %c0_i32 = arith.constant 0 : i32
    %c0_i32_0 = arith.constant 0 : i32
    %c0_i32_1 = arith.constant 0 : i32
    return %c0_i32, %c0_i32_0 : i32, i32
  }
  func.func @transform_2(%arg0: i32) -> (i32, i32) {
    %c0_i32 = arith.constant 0 : i32
    %c0_i32_0 = arith.constant 0 : i32
    %c0_i32_1 = arith.constant 0 : i32
    return %c0_i32, %c0_i32_0 : i32, i32
  }
  func.func @transform_3(%arg0: i32) -> (i32, i32) {
    %c0_i32 = arith.constant 0 : i32
    %c0_i32_0 = arith.constant 0 : i32
    %c0_i32_1 = arith.constant 0 : i32
    return %c0_i32, %c0_i32_0 : i32, i32
  }
  func.func @transform_4(%arg0: i32) -> (i32, i32) {
    %c0_i32 = arith.constant 0 : i32
    %c0_i32_0 = arith.constant 0 : i32
    %c0_i32_1 = arith.constant 0 : i32
    return %c0_i32, %c0_i32_0 : i32, i32
  }
  func.func @transform_5(%arg0: i32) -> (i32, i32) {
    %c0_i32 = arith.constant 0 : i32
    %c0_i32_0 = arith.constant 0 : i32
    %c0_i32_1 = arith.constant 0 : i32
    return %c0_i32, %c0_i32_0 : i32, i32
  }
  func.func @transform_6(%arg0: i32) -> (i32, i32) {
    %c0_i32 = arith.constant 0 : i32
    %c0_i32_0 = arith.constant 0 : i32
    %c0_i32_1 = arith.constant 0 : i32
    return %c0_i32, %c0_i32_0 : i32, i32
  }
  func.func @transform_7(%arg0: i32) -> (i32, i32) {
    %c0_i32 = arith.constant 0 : i32
    %c0_i32_0 = arith.constant 0 : i32
    return %arg0, %c0_i32 : i32, i32
  }
}

</mosaic_0001>

<bundles_post_ra>
// kernel: tpu_custom_call.1
= control target key start
LH: loop header
LB: loop body
LE: loop exit
PB: predicated region body
PF: predicated region fallthrough
CT: control target
= control target key end

     0   :  { %12 = vsyncpa [#allocation3], 0  ;;  %s1414_s0 = inlined_call_operand.vmem [shape: f32[8,128], index: 0, kind: input, shape index: {}]   ;;  %s1415_s1 = inlined_call_operand.vmem [shape: f32[128,256], index: 1, kind: input, shape index: {}]   ;;  %s1416_s2 = inlined_call_operand.vmem [shape: f32[1,256], index: 2, kind: input, shape index: {}]   ;;  %s1417_s3 = inlined_call_operand.hbm [shape: f32[256,512], index: 3, kind: input, shape index: {}]   ;;  %s1418_s4 = inlined_call_operand.vmem [shape: f32[1,512], index: 4, kind: input, shape index: {}]   ;;  %s1419_s5 = inlined_call_operand.vmem [shape: f32[512,96], index: 5, kind: input, shape index: {}]   ;;  %s1420_s6 = inlined_call_operand.vmem [shape: f32[1,96], index: 6, kind: input, shape index: {}]   ;;  %s1421_s7 = inlined_call_operand.hbm [shape: f32[8,96], index: 7, kind: output, shape index: {}]  }
   0x1   :  { %13 = vsyncpa [#allocation4], 0  ;;  %s1031_s24 = smov [#allocation2]   ;;  %s983_s28 = scalar_lea.hbm %s1417_s3, 16384 }
   0x2   :  { %s25_s25 = sshll.u32 %s1031_s24, 4  ;;  %p984_p0 = scmp.ne.s32.totalorder %s1417_s3, %s983_s28  ;;  %s26_s25 = int_to_ptr.vmem [resolvable:$true] %s25_s25 }
   0x3   :  { %p987_p1 = scmp.lt.u32.totalorder %s983_s28, %s1417_s3 }
   0x5   :  { %p989_p2 = pnand %p987_p1, %p984_p0 }
   0x7   :  { %992 = shalt.err (!%p989_p2)
}
   0x8   :  { %s993_s10 = scalar_lea.vmem %s26_s25, 16384  ;;  %p998_p4 = scmp.lt.s32.totalorder %s26_s25, %s26_s25 }
   0x9   :  { %p994_p3 = scmp.ne.s32.totalorder %s26_s25, %s993_s10  ;;  %p999_p5 = scmp.lt.s32.totalorder %s993_s10, %s993_s10 }
   0xb   :  { %p1000_p6 = por %p999_p5, %p998_p4 }
   0xd   :  { %p1001_p7 = pnand %p1000_p6, %p994_p3 }
   0xf   :  { %1004 = shalt.err (!%p1001_p7)
}
  0x10   :  { %s1032_s11 = smov 512   ;;  %s1033_s12 = smov 32  }
  0x11   :  { %31 = dma.hbm_to_vmem [thread:$0]  %s1417_s3, 16384, %s26_s25, [#allocation3], %s1032_s11, %s1032_s11, %s1033_s12  }
  0x12   :  { %1027 = dma.done.wait [#allocation3], 16384  }
  0x13   :  { %1028 = vsyncadd [#allocation3], 4294950912  ;;  %v1034_v0 = vmov 0.0   ;;  %v43_v1 = vld [vmem:[%s1415_s1 + $0x8] sm:$0xff]  ;;  %v45_v2 = vld [vmem:[%s1415_s1 + $0x18] sm:$0xff]  ;;  %s1035_s29 = smov [#allocation5]  }
  0x14   :  { %150 = vmatprep.mubr.f32.mxu0 %v1034_v0  ;;  %v42_v3 = vld [vmem:[%s1415_s1] sm:$0xff]  ;;  %v754_v4 = vpack.c.bf16 %v45_v2, %v43_v1  ;;  %v44_v5 = vld [vmem:[%s1415_s1 + $0x10] sm:$0xff]  ;;  %v47_v6 = vld [vmem:[%s1415_s1 + $0x28] sm:$0xff]  ;;  %vm666_vm0 = vcmask 785408  }
  0x15   :  { %v49_v7 = vld [vmem:[%s1415_s1 + $0x38] sm:$0xff]  ;;  %v756_v8 = vpack.c.bf16 %v44_v5, %v42_v3  ;;  %v46_v10 = vld [vmem:[%s1415_s1 + $0x20] sm:$0xff]  ;;  %v48_v11 = vld [vmem:[%s1415_s1 + $0x30] sm:$0xff] }
  0x16   :  { %v758_v9 = vpack.c.bf16 %v49_v7, %v47_v6  ;;  %v51_v12 = vld [vmem:[%s1415_s1 + $0x48] sm:$0xff]  ;;  %755 = vmatprep.subr.bf16.mxu0 %v754_v4  ;;  %v53_v13 = vld [vmem:[%s1415_s1 + $0x58] sm:$0xff]  ;;  %v760_v14 = vpack.c.bf16 %v48_v11, %v46_v10  ;;  %v50_v16 = vld [vmem:[%s1415_s1 + $0x40] sm:$0xff] }
  0x17   :  { %757 = vmatpush1.bf16.msra.mxu0 %v756_v8  ;;  %v762_v15 = vpack.c.bf16 %v53_v13, %v51_v12  ;;  %v52_v17 = vld [vmem:[%s1415_s1 + $0x50] sm:$0xff]  ;;  %v55_v18 = vld [vmem:[%s1415_s1 + $0x68] sm:$0xff]  ;;  %v57_v19 = vld [vmem:[%s1415_s1 + $0x78] sm:$0xff] }
  0x18   :  { %759 = vmatprep.subr.bf16.mxu0 %v758_v9  ;;  %v764_v20 = vpack.c.bf16 %v52_v17, %v50_v16  ;;  %v766_v21 = vpack.c.bf16 %v57_v19, %v55_v18  ;;  %v54_v22 = vld [vmem:[%s1415_s1 + $0x60] sm:$0xff]  ;;  %v56_v23 = vld [vmem:[%s1415_s1 + $0x70] sm:$0xff]  ;;  %v59_v24 = vld [vmem:[%s1415_s1 + $0x88] sm:$0xff] }
  0x19   :  { %v61_v25 = vld [vmem:[%s1415_s1 + $0x98] sm:$0xff]  ;;  %v160_v26 = vld [vmem:[#allocation2 + $0x8] sm:$0xff]  ;;  %v768_v28 = vpack.c.bf16 %v56_v23, %v54_v22  ;;  %v159_v30 = vld [vmem:[#allocation2] sm:$0xff] }
  0x1a   :  { %v164_v27 = vld [vmem:[#allocation2 + $0x28] sm:$0xff]  ;;  %v163_v31 = vld [vmem:[#allocation2 + $0x20] sm:$0xff]  ;;  %v770_v32 = vpack.c.bf16 %v61_v25, %v59_v24  ;;  %v60_v34 = vld [vmem:[%s1415_s1 + $0x90] sm:$0xff] }
  0x1b   :  { %761 = vmatpush1.bf16.msra.mxu0 %v760_v14  ;;  %v786_v29 = vpack.c.bf16 %v164_v27, %v160_v26  ;;  %v58_v33 = vld [vmem:[%s1415_s1 + $0x80] sm:$0xff]  ;;  %v788_v35 = vpack.c.bf16 %v163_v31, %v159_v30  ;;  %v168_v36 = vld [vmem:[#allocation2 + $0x48] sm:$0xff]  ;;  %v65_v38 = vld [vmem:[%s1415_s1 + $0xb8] sm:$0xff] }
  0x1c   :  { %763 = vmatprep.subr.bf16.mxu0 %v762_v15  ;;  %v63_v37 = vld [vmem:[%s1415_s1 + $0xa8] sm:$0xff]  ;;  %v167_v41 = vld [vmem:[#allocation2 + $0x40] sm:$0xff]  ;;  %v772_v43 = vpack.c.bf16 %v60_v34, %v58_v33  ;;  %v64_v49 = vld [vmem:[%s1415_s1 + $0xb0] sm:$0xff] }
  0x1d   :  { %787 = vmatprep.subr.bf16.mxu1 %v786_v29  ;;  %v172_v39 = vld [vmem:[#allocation2 + $0x68] sm:$0xff]  ;;  %v171_v42 = vld [vmem:[#allocation2 + $0x60] sm:$0xff]  ;;  %v774_v47 = vpack.c.bf16 %v65_v38, %v63_v37  ;;  %v69_v53 = vld [vmem:[%s1415_s1 + $0xd8] sm:$0xff] }
  0x1e   :  { %789 = vmatpush1.bf16.msra.mxu1 %v788_v35  ;;  %v790_v40 = vpack.c.bf16 %v172_v39, %v168_v36  ;;  %v792_v44 = vpack.c.bf16 %v171_v42, %v167_v41  ;;  %v176_v45 = vld [vmem:[#allocation2 + $0x88] sm:$0xff]  ;;  %v62_v48 = vld [vmem:[%s1415_s1 + $0xa0] sm:$0xff]  ;;  %v68_v0 = vld [vmem:[%s1415_s1 + $0xd0] sm:$0xff] }
  0x1f   :  { %765 = vmatpush1.bf16.msra.mxu0 %v764_v20  ;;  %v180_v46 = vld [vmem:[#allocation2 + $0xa8] sm:$0xff]  ;;  %v175_v51 = vld [vmem:[#allocation2 + $0x80] sm:$0xff]  ;;  %v776_v58 = vpack.c.bf16 %v64_v49, %v62_v48  ;;  %v73_v3 = vld [vmem:[%s1415_s1 + $0xf8] sm:$0xff] }
  0x20   :  { %767 = vmatprep.subr.bf16.mxu0 %v766_v21  ;;  %791 = vmatprep.subr.bf16.mxu1 %v790_v40  ;;  %v794_v50 = vpack.c.bf16 %v180_v46, %v176_v45  ;;  %v67_v52 = vld [vmem:[%s1415_s1 + $0xc8] sm:$0xff]  ;;  %v179_v54 = vld [vmem:[#allocation2 + $0xa0] sm:$0xff]  ;;  %v72_v12 = vld [vmem:[%s1415_s1 + $0xf0] sm:$0xff] }
  0x21   :  { %v796_v55 = vpack.c.bf16 %v179_v54, %v175_v51  ;;  %v184_v56 = vld [vmem:[#allocation2 + $0xc8] sm:$0xff]  ;;  %v183_v60 = vld [vmem:[#allocation2 + $0xc0] sm:$0xff]  ;;  %v778_v62 = vpack.c.bf16 %v69_v53, %v67_v52  ;;  %v162_v15 = vld [vmem:[#allocation2 + $0x18] sm:$0xff] }
  0x22   :  { %793 = vmatpush1.bf16.msra.mxu1 %v792_v44  ;;  %v188_v57 = vld [vmem:[#allocation2 + $0xe8] sm:$0xff]  ;;  %v187_v61 = vld [vmem:[#allocation2 + $0xe0] sm:$0xff]  ;;  %v166_v16 = vld [vmem:[#allocation2 + $0x38] sm:$0xff] }
  0x23   :  { %769 = vmatpush1.bf16.msra.mxu0 %v768_v28  ;;  %795 = vmatprep.subr.bf16.mxu1 %v794_v50  ;;  %v798_v59 = vpack.c.bf16 %v188_v57, %v184_v56  ;;  %v66_v63 = vld [vmem:[%s1415_s1 + $0xc0] sm:$0xff]  ;;  %v192_v1 = vld [vmem:[#allocation2 + $0x108] sm:$0xff]  ;;  %v800_v5 = vpack.c.bf16 %v187_v61, %v183_v60  ;;  %v161_v19 = vld [vmem:[#allocation2 + $0x10] sm:$0xff]  ;;  %v850_v23 = vpack.c.bf16 %v166_v16, %v162_v15 }
  0x24   :  { %771 = vmatprep.subr.bf16.mxu0 %v770_v32  ;;  %v71_v2 = vld [vmem:[%s1415_s1 + $0xe8] sm:$0xff]  ;;  %v780_v6 = vpack.c.bf16 %v68_v0, %v66_v63  ;;  %v70_v7 = vld [vmem:[%s1415_s1 + $0xe0] sm:$0xff]  ;;  %v165_v24 = vld [vmem:[#allocation2 + $0x30] sm:$0xff]  ;;  %s674_s1 = sshll.u32 %s1035_s29, 4  ;;  %s675_s1 = int_to_ptr.vmem [resolvable:$true] %s674_s1 }
  0x25   :  { %v196_v4 = vld [vmem:[#allocation2 + $0x128] sm:$0xff]  ;;  %v191_v9 = vld [vmem:[#allocation2 + $0x100] sm:$0xff]  ;;  %v782_v11 = vpack.c.bf16 %v73_v3, %v71_v2  ;;  %v784_v18 = vpack.c.bf16 %v72_v12, %v70_v7  ;;  %v170_v27 = vld [vmem:[#allocation2 + $0x58] sm:$0xff]  ;;  %v852_v31 = vpack.c.bf16 %v165_v24, %v161_v19  ;;  %s1005_s30 = scalar_lea.vmem %s675_s1, 128  ;;  %p1010_p9 = scmp.lt.s32.totalorder %s675_s1, %s675_s1 }
  0x26   :  { %797 = vmatpush1.bf16.msra.mxu1 %v796_v55  ;;  %v802_v8 = vpack.c.bf16 %v196_v4, %v192_v1  ;;  %v195_v10 = vld [vmem:[#allocation2 + $0x120] sm:$0xff]  ;;  %v200_v13 = vld [vmem:[#allocation2 + $0x148] sm:$0xff]  ;;  %v174_v28 = vld [vmem:[#allocation2 + $0x78] sm:$0xff]  ;;  %p1006_p8 = scmp.ne.s32.totalorder %s675_s1, %s1005_s30  ;;  %p1011_p10 = scmp.lt.s32.totalorder %s1005_s30, %s1005_s30 }
  0x27   :  { %773 = vmatpush1.bf16.msra.mxu0 %v772_v43  ;;  %799 = vmatprep.subr.bf16.mxu1 %v798_v59  ;;  %v204_v14 = vld [vmem:[#allocation2 + $0x168] sm:$0xff]  ;;  %v804_v17 = vpack.c.bf16 %v195_v10, %v191_v9  ;;  %v199_v21 = vld [vmem:[#allocation2 + $0x140] sm:$0xff]  ;;  %v169_v32 = vld [vmem:[#allocation2 + $0x50] sm:$0xff]  ;;  %v854_v36 = vpack.c.bf16 %v174_v28, %v170_v27 }
  0x28   :  { %775 = vmatprep.subr.bf16.mxu0 %v774_v47  ;;  %v806_v20 = vpack.c.bf16 %v204_v14, %v200_v13  ;;  %v203_v22 = vld [vmem:[#allocation2 + $0x160] sm:$0xff]  ;;  %v208_v25 = vld [vmem:[#allocation2 + $0x188] sm:$0xff]  ;;  %v173_v37 = vld [vmem:[#allocation2 + $0x70] sm:$0xff]  ;;  %p1012_p11 = por %p1011_p10, %p1010_p9 }
  0x29   :  { %v212_v26 = vld [vmem:[#allocation2 + $0x1a8] sm:$0xff]  ;;  %v41_v29 = vld [vmem:[%s1414_s0] sm:$0xff]  ;;  %v808_v30 = vpack.c.bf16 %v203_v22, %v199_v21  ;;  %v178_v40 = vld [vmem:[#allocation2 + $0x98] sm:$0xff]  ;;  %v856_v43 = vpack.c.bf16 %v173_v37, %v169_v32 }
  0x2a   :  { %801 = vmatpush1.bf16.msra.mxu1 %v800_v5  ;;  %v810_v33 = vpack.c.bf16 %v212_v26, %v208_v25  ;;  %v207_v34 = vld [vmem:[#allocation2 + $0x180] sm:$0xff]  ;;  %v216_v38 = vld [vmem:[#allocation2 + $0x1c8] sm:$0xff]  ;;  %v182_v41 = vld [vmem:[#allocation2 + $0xb8] sm:$0xff]  ;;  %p1013_p12 = pnand %p1012_p11, %p1006_p8 }
  0x2b   :  { %777 = vmatpush1.bf16.msra.mxu0 %v776_v58  ;;  %803 = vmatprep.subr.bf16.mxu1 %v802_v8  ;;  %v211_v35 = vld [vmem:[#allocation2 + $0x1a0] sm:$0xff]  ;;  %v220_v39 = vld [vmem:[#allocation2 + $0x1e8] sm:$0xff]  ;;  %v177_v44 = vld [vmem:[#allocation2 + $0x90] sm:$0xff]  ;;  %v858_v48 = vpack.c.bf16 %v182_v41, %v178_v40 }
  0x2c   :  { %779 = vmatprep.subr.bf16.mxu0 %v778_v62  ;;  %v812_v42 = vpack.c.bf16 %v211_v35, %v207_v34  ;;  %v814_v45 = vpack.c.bf16 %v220_v39, %v216_v38  ;;  %v215_v46 = vld [vmem:[#allocation2 + $0x1c0] sm:$0xff]  ;;  %v181_v49 = vld [vmem:[#allocation2 + $0xb0] sm:$0xff]  ;;  %v224_v50 = vld [vmem:[#allocation2 + $0x208] sm:$0xff] }
  0x2d   :  { %v219_v47 = vld [vmem:[#allocation2 + $0x1e0] sm:$0xff]  ;;  %v228_v51 = vld [vmem:[#allocation2 + $0x228] sm:$0xff]  ;;  %v186_v52 = vld [vmem:[#allocation2 + $0xd8] sm:$0xff]  ;;  %v860_v55 = vpack.c.bf16 %v181_v49, %v177_v44 }
  0x2e   :  { %805 = vmatpush1.bf16.msra.mxu1 %v804_v17  ;;  %v190_v53 = vld [vmem:[#allocation2 + $0xf8] sm:$0xff]  ;;  %v816_v54 = vpack.c.bf16 %v219_v47, %v215_v46  ;;  %v185_v56 = vld [vmem:[#allocation2 + $0xd0] sm:$0xff]  ;;  %v818_v57 = vpack.c.bf16 %v228_v51, %v224_v50  ;;  %v223_v58 = vld [vmem:[#allocation2 + $0x200] sm:$0xff] }
  0x2f   :  { %781 = vmatpush1.bf16.msra.mxu0 %v780_v6  ;;  %807 = vmatprep.subr.bf16.mxu1 %v806_v20  ;;  %v227_v59 = vld [vmem:[#allocation2 + $0x220] sm:$0xff]  ;;  %v862_v60 = vpack.c.bf16 %v190_v53, %v186_v52  ;;  %v189_v61 = vld [vmem:[#allocation2 + $0xf0] sm:$0xff]  ;;  %v232_v62 = vld [vmem:[#allocation2 + $0x248] sm:$0xff] }
  0x30   :  { %783 = vmatprep.subr.bf16.mxu0 %v782_v11  ;;  %v236_v63 = vld [vmem:[#allocation2 + $0x268] sm:$0xff]  ;;  %v194_v0 = vld [vmem:[#allocation2 + $0x118] sm:$0xff]  ;;  %v820_v2 = vpack.c.bf16 %v227_v59, %v223_v58  ;;  %v864_v3 = vpack.c.bf16 %v189_v61, %v185_v56  ;;  %v193_v4 = vld [vmem:[#allocation2 + $0x110] sm:$0xff] }
  0x31   :  { %v198_v1 = vld [vmem:[#allocation2 + $0x138] sm:$0xff]  ;;  %v822_v5 = vpack.c.bf16 %v236_v63, %v232_v62  ;;  %v231_v6 = vld [vmem:[#allocation2 + $0x240] sm:$0xff]  ;;  %v197_v9 = vld [vmem:[#allocation2 + $0x130] sm:$0xff] }
  0x32   :  { %809 = vmatpush1.bf16.msra.mxu1 %v808_v30  ;;  %v235_v7 = vld [vmem:[#allocation2 + $0x260] sm:$0xff]  ;;  %v866_v8 = vpack.c.bf16 %v198_v1, %v194_v0  ;;  %v240_v10 = vld [vmem:[#allocation2 + $0x288] sm:$0xff]  ;;  %v202_v12 = vld [vmem:[#allocation2 + $0x158] sm:$0xff]  ;;  %v868_v15 = vpack.c.bf16 %v197_v9, %v193_v4 }
  0x33   :  { %785 = vmatpush1.bf16.msra.mxu0 %v784_v18  ;;  %811 = vmatprep.subr.bf16.mxu1 %v810_v33  ;;  %v244_v11 = vld [vmem:[#allocation2 + $0x2a8] sm:$0xff]  ;;  %v206_v13 = vld [vmem:[#allocation2 + $0x178] sm:$0xff]  ;;  %v824_v14 = vpack.c.bf16 %v235_v7, %v231_v6  ;;  %v201_v16 = vld [vmem:[#allocation2 + $0x150] sm:$0xff] }
  0x34   :  { %851 = vmatprep.subr.bf16.mxu0 %v850_v23  ;;  %v826_v17 = vpack.c.bf16 %v244_v11, %v240_v10  ;;  %v239_v18 = vld [vmem:[#allocation2 + $0x280] sm:$0xff]  ;;  %v870_v20 = vpack.c.bf16 %v206_v13, %v202_v12  ;;  %v205_v21 = vld [vmem:[#allocation2 + $0x170] sm:$0xff]  ;;  %v248_v22 = vld [vmem:[#allocation2 + $0x2c8] sm:$0xff] }
  0x35   :  { %v243_v19 = vld [vmem:[#allocation2 + $0x2a0] sm:$0xff]  ;;  %v252_v23 = vld [vmem:[#allocation2 + $0x2e8] sm:$0xff]  ;;  %v210_v24 = vld [vmem:[#allocation2 + $0x198] sm:$0xff]  ;;  %v872_v27 = vpack.c.bf16 %v205_v21, %v201_v16 }
  0x36   :  { %151 = vmatmul.mubr.f32.vlgmr.msra.gmra.mrb[0].mxu0 %v41_v29  ;;  %813 = vmatpush1.bf16.msra.mxu1 %v812_v42  ;;  %v214_v25 = vld [vmem:[#allocation2 + $0x1b8] sm:$0xff]  ;;  %v828_v26 = vpack.c.bf16 %v243_v19, %v239_v18  ;;  %v209_v28 = vld [vmem:[#allocation2 + $0x190] sm:$0xff]  ;;  %v830_v29 = vpack.c.bf16 %v252_v23, %v248_v22  ;;  %v247_v30 = vld [vmem:[#allocation2 + $0x2c0] sm:$0xff] }
  0x37   :  { %853 = vmatpush1.bf16.msra.mxu0 %v852_v31  ;;  %815 = vmatprep.subr.bf16.mxu1 %v814_v45  ;;  %v251_v31 = vld [vmem:[#allocation2 + $0x2e0] sm:$0xff]  ;;  %v874_v32 = vpack.c.bf16 %v214_v25, %v210_v24  ;;  %v213_v33 = vld [vmem:[#allocation2 + $0x1b0] sm:$0xff]  ;;  %v256_v34 = vld [vmem:[#allocation2 + $0x308] sm:$0xff] }
  0x38   :  { %855 = vmatprep.subr.bf16.mxu0 %v854_v36  ;;  %v260_v35 = vld [vmem:[#allocation2 + $0x328] sm:$0xff]  ;;  %v218_v36 = vld [vmem:[#allocation2 + $0x1d8] sm:$0xff]  ;;  %v832_v38 = vpack.c.bf16 %v251_v31, %v247_v30  ;;  %v876_v39 = vpack.c.bf16 %v213_v33, %v209_v28  ;;  %v217_v40 = vld [vmem:[#allocation2 + $0x1d0] sm:$0xff] }
  0x39   :  { %v222_v37 = vld [vmem:[#allocation2 + $0x1f8] sm:$0xff]  ;;  %v834_v41 = vpack.c.bf16 %v260_v35, %v256_v34  ;;  %v255_v42 = vld [vmem:[#allocation2 + $0x300] sm:$0xff]  ;;  %v221_v45 = vld [vmem:[#allocation2 + $0x1f0] sm:$0xff] }
  0x3a   :  { %817 = vmatpush1.bf16.msra.mxu1 %v816_v54  ;;  %v878_v44 = vpack.c.bf16 %v222_v37, %v218_v36  ;;  %v264_v46 = vld [vmem:[#allocation2 + $0x348] sm:$0xff]  ;;  %v230_v49 = vld [vmem:[#allocation2 + $0x238] sm:$0xff]  ;;  %v880_v51 = vpack.c.bf16 %v221_v45, %v217_v40  ;;  %v225_v52 = vld [vmem:[#allocation2 + $0x210] sm:$0xff] }
  0x3b   :  { %857 = vmatpush1.bf16.msra.mxu0 %v856_v43  ;;  %819 = vmatprep.subr.bf16.mxu1 %v818_v57  ;;  %v259_v43 = vld [vmem:[#allocation2 + $0x320] sm:$0xff]  ;;  %v268_v47 = vld [vmem:[#allocation2 + $0x368] sm:$0xff]  ;;  %v229_v57 = vld [vmem:[#allocation2 + $0x230] sm:$0xff] }
  0x3c   :  { %859 = vmatprep.subr.bf16.mxu0 %v858_v48  ;;  %v226_v48 = vld [vmem:[#allocation2 + $0x218] sm:$0xff]  ;;  %v836_v50 = vpack.c.bf16 %v259_v43, %v255_v42  ;;  %v838_v53 = vpack.c.bf16 %v268_v47, %v264_v46  ;;  %v263_v54 = vld [vmem:[#allocation2 + $0x340] sm:$0xff]  ;;  %v272_v58 = vld [vmem:[#allocation2 + $0x388] sm:$0xff]  ;;  %v884_v63 = vpack.c.bf16 %v229_v57, %v225_v52 }
  0x3d   :  { %v882_v56 = vpack.c.bf16 %v230_v49, %v226_v48  ;;  %v276_v59 = vld [vmem:[#allocation2 + $0x3a8] sm:$0xff]  ;;  %v238_v61 = vld [vmem:[#allocation2 + $0x278] sm:$0xff]  ;;  %v245_v9 = vld [vmem:[#allocation2 + $0x2b0] sm:$0xff] }
  0x3e   :  { %821 = vmatpush1.bf16.msra.mxu1 %v820_v2  ;;  %v842_v0 = vpack.c.bf16 %v276_v59, %v272_v58  ;;  %v233_v2 = vld [vmem:[#allocation2 + $0x250] sm:$0xff]  ;;  %v242_v4 = vld [vmem:[#allocation2 + $0x298] sm:$0xff]  ;;  %v275_v33 = vld [vmem:[#allocation2 + $0x3a0] sm:$0xff] }
  0x3f   :  { %861 = vmatpush1.bf16.msra.mxu0 %v860_v55  ;;  %823 = vmatprep.subr.bf16.mxu1 %v822_v5  ;;  %v267_v55 = vld [vmem:[#allocation2 + $0x360] sm:$0xff]  ;;  %v246_v5 = vld [vmem:[#allocation2 + $0x2b8] sm:$0xff]  ;;  %v261_v21 = vld [vmem:[#allocation2 + $0x330] sm:$0xff] }
  0x40   :  { %863 = vmatprep.subr.bf16.mxu0 %v862_v60  ;;  %v234_v60 = vld [vmem:[#allocation2 + $0x258] sm:$0xff]  ;;  %v840_v62 = vpack.c.bf16 %v267_v55, %v263_v54  ;;  %v890_v7 = vpack.c.bf16 %v246_v5, %v242_v4  ;;  %v273_v34 = vld [vmem:[#allocation2 + $0x390] sm:$0xff]  ;;  %v279_v43 = vld [vmem:[#allocation2 + $0x3c0] sm:$0xff] }
  0x41   :  { %v886_v1 = vpack.c.bf16 %v238_v61, %v234_v60  ;;  %v250_v10 = vld [vmem:[#allocation2 + $0x2d8] sm:$0xff]  ;;  %v277_v36 = vld [vmem:[#allocation2 + $0x3b0] sm:$0xff]  ;;  %v503_v52 = vld [vmem:[%s1419_s5 + $0x180] sm:$0xff] }
  0x42   :  { %825 = vmatpush1.bf16.msra.mxu1 %v824_v14  ;;  %v254_v11 = vld [vmem:[#allocation2 + $0x2f8] sm:$0xff]  ;;  %v249_v14 = vld [vmem:[#allocation2 + $0x2d0] sm:$0xff]  ;;  %v908_v37 = vpack.c.bf16 %v277_v36, %v273_v34  ;;  %v504_v54 = vld [vmem:[%s1419_s5 + $0x188] sm:$0xff] }
  0x43   :  { %865 = vmatpush1.bf16.msra.mxu0 %v864_v3  ;;  %827 = vmatprep.subr.bf16.mxu1 %v826_v17  ;;  %v237_v3 = vld [vmem:[#allocation2 + $0x270] sm:$0xff]  ;;  %v894_v13 = vpack.c.bf16 %v254_v11, %v250_v10  ;;  %v258_v16 = vld [vmem:[#allocation2 + $0x318] sm:$0xff]  ;;  %v946_v55 = vpack.c.bf16 %v504_v54, %v503_v52  ;;  %v74_v59 = vld [vmem:[%s1416_s2] sm:$0x3] }
  0x44   :  { %867 = vmatprep.subr.bf16.mxu0 %v866_v8  ;;  %v888_v6 = vpack.c.bf16 %v237_v3, %v233_v2  ;;  %v241_v8 = vld [vmem:[#allocation2 + $0x290] sm:$0xff]  ;;  %v262_v17 = vld [vmem:[#allocation2 + $0x338] sm:$0xff]  ;;  %v487_v4 = vld [vmem:[%s1419_s5 + $0x100] sm:$0xff] }
  0x45   :  { %v892_v12 = vpack.c.bf16 %v245_v9, %v241_v8  ;;  %v898_v19 = vpack.c.bf16 %v262_v17, %v258_v16  ;;  %v266_v22 = vld [vmem:[#allocation2 + $0x358] sm:$0xff]  ;;  %v281_v47 = vld [vmem:[#allocation2 + $0x3d0] sm:$0xff]  ;;  %v488_v5 = vld [vmem:[%s1419_s5 + $0x108] sm:$0xff] }
  0x46   :  { %829 = vmatpush1.bf16.msra.mxu1 %v828_v26  ;;  %v270_v23 = vld [vmem:[#allocation2 + $0x378] sm:$0xff]  ;;  %v265_v26 = vld [vmem:[#allocation2 + $0x350] sm:$0xff]  ;;  %v464_v52 = vld [vmem:[%s1419_s5 + $0x48] sm:$0xff] }
  0x47   :  { %869 = vmatpush1.bf16.msra.mxu0 %v868_v15  ;;  %831 = vmatprep.subr.bf16.mxu1 %v830_v29  ;;  %v253_v15 = vld [vmem:[#allocation2 + $0x2f0] sm:$0xff]  ;;  %v902_v25 = vpack.c.bf16 %v270_v23, %v266_v22  ;;  %v274_v28 = vld [vmem:[#allocation2 + $0x398] sm:$0xff]  ;;  %v476_v22 = vld [vmem:[%s1419_s5 + $0xa8] sm:$0xff] }
  0x48   :  { %871 = vmatprep.subr.bf16.mxu0 %v870_v20  ;;  %v896_v18 = vpack.c.bf16 %v253_v15, %v249_v14  ;;  %v257_v20 = vld [vmem:[#allocation2 + $0x310] sm:$0xff]  ;;  %v278_v29 = vld [vmem:[#allocation2 + $0x3b8] sm:$0xff]  ;;  %v507_v23 = vld [vmem:[%s1419_s5 + $0x1a0] sm:$0xff] }
  0x49   :  { %v900_v24 = vpack.c.bf16 %v261_v21, %v257_v20  ;;  %v906_v31 = vpack.c.bf16 %v278_v29, %v274_v28  ;;  %v282_v40 = vld [vmem:[#allocation2 + $0x3d8] sm:$0xff]  ;;  %v285_v48 = vld [vmem:[#allocation2 + $0x3f0] sm:$0xff]  ;;  %v475_v21 = vld [vmem:[%s1419_s5 + $0xa0] sm:$0xff] }
  0x4a   :  { %833 = vmatpush1.bf16.msra.mxu1 %v832_v38  ;;  %v280_v38 = vld [vmem:[#allocation2 + $0x3c8] sm:$0xff]  ;;  %v286_v42 = vld [vmem:[#allocation2 + $0x3f8] sm:$0xff]  ;;  %v912_v49 = vpack.c.bf16 %v285_v48, %v281_v47  ;;  %v505_v9 = vld [vmem:[%s1419_s5 + $0x190] sm:$0xff]  ;;  %v922_v29 = vpack.c.bf16 %v476_v22, %v475_v21 }
  0x4b   :  { %873 = vmatpush1.bf16.msra.mxu0 %v872_v27  ;;  %835 = vmatprep.subr.bf16.mxu1 %v834_v41  ;;  %v269_v27 = vld [vmem:[#allocation2 + $0x370] sm:$0xff]  ;;  %v910_v45 = vpack.c.bf16 %v286_v42, %v282_v40  ;;  %v474_v8 = vld [vmem:[%s1419_s5 + $0x98] sm:$0xff]  ;;  %v460_v28 = vld [vmem:[%s1419_s5 + $0x28] sm:$0xff] }
  0x4c   :  { %875 = vmatprep.subr.bf16.mxu0 %v874_v32  ;;  %v904_v30 = vpack.c.bf16 %v269_v27, %v265_v26  ;;  %v271_v32 = vld [vmem:[#allocation2 + $0x380] sm:$0xff]  ;;  %v506_v10 = vld [vmem:[%s1419_s5 + $0x198] sm:$0xff]  ;;  %v457_v14 = vld [vmem:[%s1419_s5 + $0x10] sm:$0xff] }
  0x4d   :  { %v844_v35 = vpack.c.bf16 %v275_v33, %v271_v32  ;;  %v458_v15 = vld [vmem:[%s1419_s5 + $0x18] sm:$0xff]  ;;  %v459_v27 = vld [vmem:[%s1419_s5 + $0x20] sm:$0xff]  ;;  %v492_v32 = vld [vmem:[%s1419_s5 + $0x128] sm:$0xff] }
  0x4e   :  { %837 = vmatpush1.bf16.msra.mxu1 %v836_v50  ;;  %v471_v50 = vld [vmem:[%s1419_s5 + $0x80] sm:$0xff]  ;;  %v490_v20 = vld [vmem:[%s1419_s5 + $0x118] sm:$0xff]  ;;  %v477_v33 = vld [vmem:[%s1419_s5 + $0xb0] sm:$0xff] }
  0x4f   :  { %877 = vmatpush1.bf16.msra.mxu0 %v876_v39  ;;  %839 = vmatprep.subr.bf16.mxu1 %v838_v53  ;;  %v284_v39 = vld [vmem:[#allocation2 + $0x3e8] sm:$0xff]  ;;  %v478_v34 = vld [vmem:[%s1419_s5 + $0xb8] sm:$0xff]  ;;  %v511_v47 = vld [vmem:[%s1419_s5 + $0x1c0] sm:$0xff] }
  0x50   :  { %879 = vmatprep.subr.bf16.mxu0 %v878_v44  ;;  %v846_v41 = vpack.c.bf16 %v284_v39, %v280_v38  ;;  %v283_v44 = vld [vmem:[#allocation2 + $0x3e0] sm:$0xff]  ;;  %v510_v36 = vld [vmem:[%s1419_s5 + $0x1b8] sm:$0xff]  ;;  %v461_v39 = vld [vmem:[%s1419_s5 + $0x30] sm:$0xff] }
  0x51   :  { %v848_v46 = vpack.c.bf16 %v283_v44, %v279_v43  ;;  %v462_v40 = vld [vmem:[%s1419_s5 + $0x38] sm:$0xff]  ;;  %v493_v43 = vld [vmem:[%s1419_s5 + $0x130] sm:$0xff]  ;;  %v512_v48 = vld [vmem:[%s1419_s5 + $0x1c8] sm:$0xff] }
  0x52   :  { %841 = vmatpush1.bf16.msra.mxu1 %v840_v62  ;;  %v494_v44 = vld [vmem:[%s1419_s5 + $0x138] sm:$0xff]  ;;  %v962_v54 = vpack.c.bf16 %v512_v48, %v511_v47  ;;  %v485_v22 = vld [vmem:[%s1419_s5 + $0xf0] sm:$0xff] }
  0x53   :  { %881 = vmatpush1.bf16.msra.mxu0 %v880_v51  ;;  %843 = vmatprep.subr.bf16.mxu1 %v842_v0  ;;  %v472_v51 = vld [vmem:[%s1419_s5 + $0x88] sm:$0xff]  ;;  %v455_v0 = vld [vmem:[%s1419_s5] sm:$0xff] }
  0x54   :  { %883 = vmatprep.subr.bf16.mxu0 %v882_v56  ;;  %v914_v53 = vpack.c.bf16 %v472_v51, %v471_v50  ;;  %v76_v56 = vlaneseq  ;;  %v960_v50 = vpack.c.bf16 %v494_v44, %v493_v43  ;;  %v463_v51 = vld [vmem:[%s1419_s5 + $0x40] sm:$0xff] }
  0x56   :  { %845 = vmatpush1.bf16.msra.mxu1 %v844_v35  ;;  %v1199_v57 = vshrl.u32 %v76_v56, 7  ;;  %v509_v35 = vld [vmem:[%s1419_s5 + $0x1b0] sm:$0xff]  ;;  %v496_v56 = vld [vmem:[%s1419_s5 + $0x148] sm:$0xff] }
  0x57   :  { %885 = vmatpush1.bf16.msra.mxu0 %v884_v63  ;;  %847 = vmatprep.subr.bf16.mxu1 %v846_v41  ;;  %v926_v41 = vpack.c.bf16 %v478_v34, %v477_v33  ;;  %v958_v42 = vpack.c.bf16 %v510_v36, %v509_v35  ;;  %v287_v35 = vld [vmem:[%s1418_s4] sm:$0xf] }
  0x58   :  { %887 = vmatprep.subr.bf16.mxu0 %v886_v1  ;;  %v78_v58 = vsub.s32 0, %v1199_v57  ;;  %v82_v60 = vsub.s32 1, %v1199_v57  ;;  %v456_v1 = vld [vmem:[%s1419_s5 + $0x8] sm:$0xff]  ;;  %v299_v34 = vsub.s32 2, %v1199_v57  ;;  %v303_v36 = vsub.s32 3, %v1199_v57 }
  0x5a   :  { %849 = vmatpush1.bf16.msra.mxu1 %v848_v46  ;;  %v79_v61 = vrot.slane %v74_v59, %v78_v58  ;;  %v83_v62 = vrot.slane %v74_v59, %v82_v60  ;;  %v480_v46 = vld [vmem:[%s1419_s5 + $0xc8] sm:$0xff]  ;;  %v481_v59 = vld [vmem:[%s1419_s5 + $0xd0] sm:$0xff] }
  0x5b   :  { %889 = vmatpush1.bf16.msra.mxu0 %v888_v6  ;;  %915 = vmatprep.subr.bf16.mxu1 %v914_v53  ;;  %v473_v6 = vld [vmem:[%s1419_s5 + $0x90] sm:$0xff] }
  0x5c   :  { %891 = vmatprep.subr.bf16.mxu0 %v890_v7  ;;  %v918_v17 = vpack.c.bf16 %v474_v8, %v473_v6  ;;  %v497_v6 = vld [vmem:[%s1419_s5 + $0x150] sm:$0xff]  ;;  %v483_v8 = vld [vmem:[%s1419_s5 + $0xe0] sm:$0xff] }
  0x5f   :  { %893 = vmatpush1.bf16.msra.mxu0 %v892_v12  ;;  %v916_v12 = vpack.c.bf16 %v456_v1, %v455_v0  ;;  %v932_v0 = vpack.c.bf16 %v464_v52, %v463_v51 }
  0x60   :  { %895 = vmatprep.subr.bf16.mxu0 %v894_v13  ;;  %v948_v13 = vpack.c.bf16 %v488_v5, %v487_v4 }
  0x63   :  { %897 = vmatpush1.bf16.msra.mxu0 %v896_v18  ;;  %v950_v18 = vpack.c.bf16 %v506_v10, %v505_v9  ;;  %v484_v9 = vld [vmem:[%s1419_s5 + $0xe8] sm:$0xff]  ;;  %v515_v10 = vld [vmem:[%s1419_s5 + $0x1e0] sm:$0xff] }
  0x64   :  { %899 = vmatprep.subr.bf16.mxu0 %v898_v19  ;;  %v489_v19 = vld [vmem:[%s1419_s5 + $0x110] sm:$0xff] }
  0x65   :  { %v952_v26 = vpack.c.bf16 %v490_v20, %v489_v19  ;;  %v500_v20 = vld [vmem:[%s1419_s5 + $0x168] sm:$0xff] }
  0x67   :  { %901 = vmatpush1.bf16.msra.mxu0 %v900_v24  ;;  %v508_v24 = vld [vmem:[%s1419_s5 + $0x1a8] sm:$0xff] }
  0x68   :  { %903 = vmatprep.subr.bf16.mxu0 %v902_v25  ;;  %v920_v25 = vpack.c.bf16 %v458_v15, %v457_v14  ;;  %v938_v14 = vpack.c.bf16 %v484_v9, %v483_v8 }
  0x6b   :  { %905 = vmatpush1.bf16.msra.mxu0 %v904_v30  ;;  %v954_v30 = vpack.c.bf16 %v508_v24, %v507_v23  ;;  %v486_v23 = vld [vmem:[%s1419_s5 + $0xf8] sm:$0xff]  ;;  %v517_v24 = vld [vmem:[%s1419_s5 + $0x1f0] sm:$0xff] }
  0x6c   :  { %907 = vmatprep.subr.bf16.mxu0 %v906_v31  ;;  %v491_v31 = vld [vmem:[%s1419_s5 + $0x120] sm:$0xff] }
  0x6d   :  { %v956_v38 = vpack.c.bf16 %v492_v32, %v491_v31  ;;  %v501_v31 = vld [vmem:[%s1419_s5 + $0x170] sm:$0xff]  ;;  %v502_v32 = vld [vmem:[%s1419_s5 + $0x178] sm:$0xff] }
  0x6e   :  { %v976_v33 = vpack.c.bf16 %v502_v32, %v501_v31 }
  0x6f   :  { %909 = vmatpush1.bf16.msra.mxu0 %v908_v37  ;;  %v924_v37 = vpack.c.bf16 %v460_v28, %v459_v27  ;;  %v469_v27 = vld [vmem:[%s1419_s5 + $0x70] sm:$0xff]  ;;  %v470_v28 = vld [vmem:[%s1419_s5 + $0x78] sm:$0xff] }
  0x70   :  { %911 = vmatprep.subr.bf16.mxu0 %v910_v45  ;;  %v479_v45 = vld [vmem:[%s1419_s5 + $0xc0] sm:$0xff] }
  0x71   :  { %v930_v53 = vpack.c.bf16 %v480_v46, %v479_v45 }
  0x73   :  { %913 = vmatpush1.bf16.msra.mxu0 %v912_v49  ;;  %v928_v49 = vpack.c.bf16 %v462_v40, %v461_v39  ;;  %v296_v39 = vrot.slane %v287_v35, %v82_v60  ;;  %v304_v40 = vrot.slane %v287_v35, %v303_v36  ;;  %v683_v60 = vld [vmem:[%s1420_s6] ss:$0 sm:$0xff] }
  0x74   :  { %947 = vmatprep.subr.bf16.mxu0 %v946_v55  ;;  %v495_v55 = vld [vmem:[%s1419_s5 + $0x140] sm:$0xff] }
  0x75   :  { %v964_v1 = vpack.c.bf16 %v496_v56, %v495_v55 }
 0x109   :  { %v152_v63 = vpop.f32.mrb[0].mxu0 }
 0x10a   :  { %v153_v2 = vadd.f32 %v152_v63, %v79_v61  ;;  %v154_v3 = vpop.f32.mrb[1].mxu0  ;;  %v482_v61 = vld [vmem:[%s1419_s5 + $0xd8] sm:$0xff] }
 0x10b   :  { %v155_v7 = vadd.f32 %v154_v3, %v83_v62  ;;  %v513_v62 = vld [vmem:[%s1419_s5 + $0x1d0] sm:$0xff]  ;;  %v514_v63 = vld [vmem:[%s1419_s5 + $0x1d8] sm:$0xff]  ;;  %v934_v4 = vpack.c.bf16 %v482_v61, %v481_v59 }
 0x10c   :  { %v157_v16 = vmax.f32 %v153_v2, 0.0  ;;  %v465_v2 = vld [vmem:[%s1419_s5 + $0x50] sm:$0xff]  ;;  %v466_v3 = vld [vmem:[%s1419_s5 + $0x58] sm:$0xff]  ;;  %v966_v5 = vpack.c.bf16 %v514_v63, %v513_v62 }
 0x10d   :  { %v158_v11 = vmax.f32 %v155_v7, 0.0  ;;  %v498_v7 = vld [vmem:[%s1419_s5 + $0x158] sm:$0xff] }
 0x10f   :  { %373 = vmatprep.mubr.f32.mxu1 %v158_v11  ;;  %444 = vmatprep.mubr.f32.mxu0 %v158_v11  ;;  %v516_v11 = vld [vmem:[%s1419_s5 + $0x1e8] sm:$0xff] }
 0x110   :  { %374 = vmatmul.mubr.f32.vlgmr.msra.gmra.mrb[0].mxu1 %v157_v16  ;;  %445 = vmatmul.mubr.f32.vlgmr.msra.gmra.mrb[2].mxu0 %v157_v16  ;;  %v970_v15 = vpack.c.bf16 %v516_v11, %v515_v10  ;;  %v467_v16 = vld [vmem:[%s1419_s5 + $0x60] sm:$0xff] }
 0x111   :  { %917 = vmatpush3.bf16.msra.mxu1 %v916_v12  ;;  %949 = vmatpush3.bf16.msra.mxu0 %v948_v13  ;;  %v936_v12 = vpack.c.bf16 %v466_v3, %v465_v2  ;;  %v968_v13 = vpack.c.bf16 %v498_v7, %v497_v6 }
 0x112   :  { %919 = vmatprep.subr.bf16.mxu1 %v918_v17  ;;  %951 = vmatprep.subr.bf16.mxu0 %v950_v18  ;;  %v468_v17 = vld [vmem:[%s1419_s5 + $0x68] sm:$0xff]  ;;  %v499_v18 = vld [vmem:[%s1419_s5 + $0x160] sm:$0xff] }
 0x113   :  { %v940_v19 = vpack.c.bf16 %v468_v17, %v467_v16  ;;  %v972_v21 = vpack.c.bf16 %v500_v20, %v499_v18 }
 0x115   :  { %921 = vmatpush3.bf16.msra.mxu1 %v920_v25  ;;  %953 = vmatpush3.bf16.msra.mxu0 %v952_v26  ;;  %v942_v25 = vpack.c.bf16 %v486_v23, %v485_v22  ;;  %v518_v26 = vld [vmem:[%s1419_s5 + $0x1f8] sm:$0xff] }
 0x116   :  { %923 = vmatprep.subr.bf16.mxu1 %v922_v29  ;;  %955 = vmatprep.subr.bf16.mxu0 %v954_v30  ;;  %v974_v29 = vpack.c.bf16 %v518_v26, %v517_v24  ;;  %v944_v30 = vpack.c.bf16 %v470_v28, %v469_v27 }
 0x119   :  { %925 = vmatpush3.bf16.msra.mxu1 %v924_v37  ;;  %957 = vmatpush3.bf16.msra.mxu0 %v956_v38  ;;  %v292_v37 = vrot.slane %v287_v35, %v78_v58  ;;  %v300_v38 = vrot.slane %v287_v35, %v299_v34 }
 0x11a   :  { %927 = vmatprep.subr.bf16.mxu1 %v926_v41  ;;  %959 = vmatprep.subr.bf16.mxu0 %v958_v42 }
 0x11d   :  { %929 = vmatpush3.bf16.msra.mxu1 %v928_v49  ;;  %961 = vmatpush3.bf16.msra.mxu0 %v960_v50 }
 0x11e   :  { %931 = vmatprep.subr.bf16.mxu1 %v930_v53  ;;  %963 = vmatprep.subr.bf16.mxu0 %v962_v54 }
 0x121   :  { %933 = vmatpush3.bf16.msra.mxu1 %v932_v0  ;;  %965 = vmatpush3.bf16.msra.mxu0 %v964_v1 }
 0x122   :  { %935 = vmatprep.subr.bf16.mxu1 %v934_v4  ;;  %967 = vmatprep.subr.bf16.mxu0 %v966_v5 }
 0x125   :  { %937 = vmatpush3.bf16.msra.mxu1 %v936_v12  ;;  %969 = vmatpush3.bf16.msra.mxu0 %v968_v13 }
 0x126   :  { %939 = vmatprep.subr.bf16.mxu1 %v938_v14  ;;  %971 = vmatprep.subr.bf16.mxu0 %v970_v15 }
 0x129   :  { %941 = vmatpush3.bf16.msra.mxu1 %v940_v19  ;;  %973 = vmatpush3.bf16.msra.mxu0 %v972_v21 }
 0x12a   :  { %943 = vmatprep.subr.bf16.mxu1 %v942_v25  ;;  %975 = vmatprep.subr.bf16.mxu0 %v974_v29 }
 0x12d   :  { %945 = vmatpush3.bf16.msra.mxu1 %v944_v30  ;;  %977 = vmatpush3.bf16.msra.mxu0 %v976_v33 }
 0x1e3   :  { %v375_v41 = vpop.f32.mrb[0].mxu1  ;;  %v446_v42 = vpop.f32.mrb[2].mxu0 }
 0x1e4   :  { %v376_v43 = vadd.f32 %v375_v41, %v292_v37  ;;  %v447_v44 = vadd.f32 %v446_v42, %v300_v38  ;;  %v377_v45 = vpop.f32.mrb[1].mxu1  ;;  %v448_v46 = vpop.f32.mrb[3].mxu0 }
 0x1e5   :  { %v378_v47 = vadd.f32 %v377_v45, %v296_v39  ;;  %v449_v48 = vadd.f32 %v448_v46, %v304_v40 }
 0x1e6   :  { %v451_v51 = vmax.f32 %v376_v43, 0.0  ;;  %v453_v52 = vmax.f32 %v447_v44, 0.0 }
 0x1e7   :  { %v452_v49 = vmax.f32 %v378_v47, 0.0  ;;  %v454_v50 = vmax.f32 %v449_v48, 0.0 }
 0x1e9   :  { %590 = vmatprep.mubr.f32.mxu1 %v452_v49  ;;  %660 = vmatprep.mubr.f32.mxu0 %v454_v50 }
 0x1ea   :  { %591 = vmatmul.mubr.f32.vlgmr.msra.gmra.mrb[2].mxu1 %v451_v51  ;;  %661 = vmatmul.mubr.f32.vlgmr.msra.gmra.mrb[4].mxu0 %v453_v52 }
 0x2bd   :  { %v716_v58 = vpop.f32.mrb[2].mxu1  ;;  %v751_v57 = vpop.f32.mrb[4].mxu0 }
 0x2be   :  { %v717_v53 = vpop.f32.mrb[3].mxu1  ;;  %v752_v54 = vpop.f32.mrb[5].mxu0 }
 0x2bf   :  { %v718_v55 = vadd.f32 %v717_v53, %v716_v58  ;;  %v753_v56 = vadd.f32 %v752_v54, %v751_v57 }
 0x2c1   :  { %v593_v59 = vadd.f32 %v718_v55, %v683_v60 }
 0x2c3   :  { %v663_v61 = vadd.f32 %v753_v56, %v593_v59 }
 0x2c5   :  { %667 = vst.msk [vmem:[#allocation5] sm:$0xff] %vm666_vm0, %v663_v61 }
 0x2c6   :  { %1016 = shalt.err (!%p1013_p12)
}
 0x2c7   :  { %s1017_s8 = scalar_lea.hbm %s1421_s7, 128 }
 0x2c8   :  { %p1018_p13 = scmp.ne.s32.totalorder %s1421_s7, %s1017_s8  ;;  %p1021_p0 = scmp.lt.u32.totalorder %s1017_s8, %s1421_s7 }
 0x2ca   :  { %p1023_p1 = pnand %p1021_p0, %p1018_p13 }
 0x2cc   :  { %1026 = shalt.err (!%p1023_p1)
}
 0x2cd   :  { %677 = dma.vmem_to_hbm [thread:$0]  %s675_s1, 128, %s1421_s7, [#allocation4]  }
 0x2ce   :  { %1029 = dma.done.wait [#allocation4], 128  }
 0x2cf   :  { %1030 = vsyncadd [#allocation4], 4294967168 }
 0x2d0   :  { %681 = vsyncpa [#allocation3], 1 }
 0x2d1   :  { %682 = vsyncpa [#allocation4], 1 }

</bundles_post_ra>
